<compile_context>
chip_gen: v6e
topology: v6e:2x2x1
jax: 0.10.0
libtpu: 0.0.40
codegen_flags: <defaults>
</compile_context>

<pallas_src>
import functools
from typing import NamedTuple

import jax
import jax.numpy as jnp
from jax.experimental import pallas as pl
from jax.experimental.pallas import tpu as pltpu


def _round_up(x: int, m: int) -> int:
    return ((x + m - 1) // m) * m


class DecoderConfig(NamedTuple):
    embedding_size: int
    hidden_size: int
    hidden_pad: int     # Hp = round_up(H, 128)
    input_pad: int      # Dp = round_up(max(E, H), 128): width of the layer-input slot
    output_size: int
    output_pad: int     # Op = round_up(O, 128)
    num_layers: int


# --------------------------------------------------------------------------
# Fused decoder kernel: embedding gather + L LSTM layers + fc, one pallas_call
# --------------------------------------------------------------------------
def _decoder_step_kernel(tok_ref,                 # SMEM (B,)          int32 (scalar prefetch)
                         emb_ref,                 # VMEM (Vp, Dp)      f32
                         h_in_ref, c_in_ref,      # VMEM (B, Hp)       f32  (layer slice)
                         w_ref,                   # VMEM (Dp+Hp, 4Hp)  bf16 (layer slice)
                         b_ref,                   # VMEM (1, 4Hp)      f32  (layer slice)
                         fcw_ref,                 # VMEM (Hp, Op)      bf16
                         fcb_ref,                 # VMEM (1, Op)       f32
                         h_out_ref, c_out_ref,    # VMEM (B, Hp)       f32  (layer slice)
                         pred_ref,                # VMEM (B, Op)       f32
                         x_scr,                   # VMEM (B, Dp+Hp)    f32  scratch (carried)
                         *, batch, in_pad, hidden_pad):
    layer = pl.program_id(0)
    last_layer = pl.num_programs(0) - 1
    dp, hp = in_pad, hidden_pad

    # ---- layer 0: gather embedding rows for the current tokens ------------
    # (nn.Dropout on the embedding is the identity in eval mode.)
    @pl.when(layer == 0)
    def _():
        for i in range(batch):                    # B is small & static -> unrolled
            tok = tok_ref[i]
            x_scr[pl.ds(i, 1), pl.ds(0, dp)] = emb_ref[pl.ds(tok, 1), :]

    # ---- single fused gate matmul: gates = [x, h] @ [W_ih; W_hh] + b ------
    x_scr[:, dp:dp + hp] = h_in_ref[...]
    xh = x_scr[...].astype(jnp.bfloat16)          # bf16 MXU operands
    gates = (jnp.dot(xh, w_ref[...], preferred_element_type=jnp.float32)
             + b_ref[...])                        # f32 accumulation, (B, 4*Hp)

    # 128-lane-aligned gate slices (PyTorch gate order: i, f, g, o)
    i_g = jax.nn.sigmoid(gates[:, 0 * hp:1 * hp])
    f_g = jax.nn.sigmoid(gates[:, 1 * hp:2 * hp])
    g_g = jnp.tanh(gates[:, 2 * hp:3 * hp])
    o_g = jax.nn.sigmoid(gates[:, 3 * hp:4 * hp])

    c_new = f_g * c_in_ref[...] + i_g * g_g
    h_new = o_g * jnp.tanh(c_new)

    h_out_ref[...] = h_new
    c_out_ref[...] = c_new

    # ---- stage this layer's hidden as the next layer's input --------------
    # (inter-layer nn.LSTM dropout is the identity in eval mode.)
    x_scr[:, 0:hp] = h_new
    if dp > hp:                                   # static; skipped when Dp == Hp
        x_scr[:, hp:dp] = jnp.zeros((batch, dp - hp), jnp.float32)

    # ---- final layer: fused fc projection (lane-dense (B, Op) store) ------
    @pl.when(layer == last_layer)
    def _():
        pred_ref[...] = (jnp.dot(h_new.astype(jnp.bfloat16), fcw_ref[...],
                                 preferred_element_type=jnp.float32)
                         + fcb_ref[...])


# --------------------------------------------------------------------------
# Wrapper
# --------------------------------------------------------------------------
def decoder_forward(params, cfg: DecoderConfig, x_tokens, hidden_state, cell_state):
    """x_tokens: (B,) int; hidden_state/cell_state: (L, B, H) float32.

    Returns (predictions (B, O), hidden_state (L, B, H), cell_state (L, B, H)),
    matching PyTorch Decoder.forward in eval mode.
    """
    L = cfg.num_layers
    H, Hp = cfg.hidden_size, cfg.hidden_pad
    Dp, Op, O = cfg.input_pad, cfg.output_pad, cfg.output_size
    B = x_tokens.shape[0]
    Vp = params["embedding"].shape[0]

    if Hp != H:
        pad = ((0, 0), (0, 0), (0, Hp - H))
        h_p = jnp.pad(hidden_state.astype(jnp.float32), pad)
        c_p = jnp.pad(cell_state.astype(jnp.float32), pad)
    else:
        h_p = hidden_state.astype(jnp.float32)
        c_p = cell_state.astype(jnp.float32)

    kernel = functools.partial(_decoder_step_kernel, batch=B, in_pad=Dp,
                               hidden_pad=Hp)

    grid_spec = pltpu.PrefetchScalarGridSpec(
        num_scalar_prefetch=1,                    # token ids -> SMEM
        grid=(L,),
        in_specs=[
            pl.BlockSpec((Vp, Dp), lambda l, tok: (0, 0)),                    # embedding (VMEM-resident)
            pl.BlockSpec((None, B, Hp), lambda l, tok: (l, 0, 0)),            # h_in[layer]
            pl.BlockSpec((None, B, Hp), lambda l, tok: (l, 0, 0)),            # c_in[layer]
            pl.BlockSpec((None, Dp + Hp, 4 * Hp), lambda l, tok: (l, 0, 0)),  # packed W[layer]
            pl.BlockSpec((None, 1, 4 * Hp), lambda l, tok: (l, 0, 0)),        # packed b[layer]
            pl.BlockSpec((Hp, Op), lambda l, tok: (0, 0)),                    # fc weight
            pl.BlockSpec((1, Op), lambda l, tok: (0, 0)),                     # fc bias
        ],
        out_specs=(
            pl.BlockSpec((None, B, Hp), lambda l, tok: (l, 0, 0)),            # h_out[layer]
            pl.BlockSpec((None, B, Hp), lambda l, tok: (l, 0, 0)),            # c_out[layer]
            pl.BlockSpec((B, Op), lambda l, tok: (0, 0)),                     # predictions
        ),
        scratch_shapes=[pltpu.VMEM((B, Dp + Hp), jnp.float32)],               # carried layer input
    )

    h_out_p, c_out_p, preds_p = pl.pallas_call(
        kernel,
        grid_spec=grid_spec,
        out_shape=(jax.ShapeDtypeStruct((L, B, Hp), jnp.float32),
                   jax.ShapeDtypeStruct((L, B, Hp), jnp.float32),
                   jax.ShapeDtypeStruct((B, Op), jnp.float32)),
        compiler_params=pltpu.CompilerParams(
            dimension_semantics=("arbitrary",)),   # layers are sequential
    )(x_tokens.astype(jnp.int32), params["embedding"], h_p, c_p,
      params["w_cat"], params["b_cat"], params["fc_w"], params["fc_b"])

    # TODO(synk): in an autoregressive decode loop, keep the *padded* h/c state
    # resident across steps (input_output_aliases) instead of re-pad/slice here.
    preds = preds_p[:, :O]
    if Hp != H:
        return preds, h_out_p[..., :H], c_out_p[..., :H]
    return preds, h_out_p, c_out_p


# --------------------------------------------------------------------------
# Parameter init (PyTorch-equivalent distributions, packed/padded for the kernel)
# --------------------------------------------------------------------------
def init_decoder_params(key, input_size, embedding_size, hidden_size,
                        num_layers, output_size, dropout_p=0.0,
                        param_dtype=jnp.bfloat16):
    """Returns (params, config, raw).  `raw` keeps PyTorch-layout f32 weights
    for the pure-JAX reference.  `dropout_p` kept for API parity (eval mode)."""
    del dropout_p
    E, H, O, V, L = embedding_size, hidden_size, output_size, input_size, num_layers
    Hp = _round_up(H, 128)
    Dp = _round_up(max(E, H), 128)
    Op = _round_up(O, 128)
    Vp = _round_up(V, 8)

    keys = jax.random.split(key, 3 + 4 * L)
    k_iter = iter(keys)
    bound = 1.0 / float(H) ** 0.5

    # nn.Embedding: N(0, 1); stored zero-padded to (Vp, Dp) so the kernel's
    # layer-0 input slot is already padded after the row gather.
    emb = jax.random.normal(next(k_iter), (V, E), jnp.float32)
    emb_p = jnp.zeros((Vp, Dp), jnp.float32).at[:V, :E].set(emb)

    raw_layers, w_layers, b_layers = [], [], []
    for layer in range(L):
        in_sz = E if layer == 0 else H
        w_ih = jax.random.uniform(next(k_iter), (4 * H, in_sz), jnp.float32, -bound, bound)
        w_hh = jax.random.uniform(next(k_iter), (4 * H, H), jnp.float32, -bound, bound)
        b_ih = jax.random.uniform(next(k_iter), (4 * H,), jnp.float32, -bound, bound)
        b_hh = jax.random.uniform(next(k_iter), (4 * H,), jnp.float32, -bound, bound)
        raw_layers.append({"w_ih": w_ih, "w_hh": w_hh, "b_ih": b_ih, "b_hh": b_hh})

        # Pack [W_ih; W_hh] transposed into (Dp+Hp, 4*Hp): rows [0:in_sz] hold
        # the input weights, rows [Dp:Dp+H] the hidden weights; each gate gets
        # a 128-lane-aligned column block of width Hp (pad rows/cols stay 0).
        w = jnp.zeros((Dp + Hp, 4 * Hp), jnp.float32)
        b = jnp.zeros((1, 4 * Hp), jnp.float32)
        for g in range(4):
            w = w.at[:in_sz, g * Hp:g * Hp + H].set(w_ih[g * H:(g + 1) * H, :].T)
            w = w.at[Dp:Dp + H, g * Hp:g * Hp + H].set(w_hh[g * H:(g + 1) * H, :].T)
            b = b.at[0, g * Hp:g * Hp + H].set(b_ih[g * H:(g + 1) * H]
                                               + b_hh[g * H:(g + 1) * H])
        w_layers.append(w)
        b_layers.append(b)

    fc_w = jax.random.uniform(next(k_iter), (O, H), jnp.float32, -bound, bound)
    fc_b = jax.random.uniform(next(k_iter), (O,), jnp.float32, -bound, bound)
    fc_w_p = jnp.zeros((Hp, Op), jnp.float32).at[:H, :O].set(fc_w.T)
    fc_b_p = jnp.zeros((1, Op), jnp.float32).at[0, :O].set(fc_b)

    params = {
        "embedding": emb_p,                                  # (Vp, Dp)        f32
        "w_cat": jnp.stack(w_layers).astype(param_dtype),    # (L, Dp+Hp, 4Hp) bf16
        "b_cat": jnp.stack(b_layers),                        # (L, 1, 4Hp)     f32
        "fc_w": fc_w_p.astype(param_dtype),                  # (Hp, Op)        bf16
        "fc_b": fc_b_p,                                      # (1, Op)         f32
    }
    raw = {"embedding": emb, "lstm": raw_layers, "fc_w": fc_w, "fc_b": fc_b}
    cfg = DecoderConfig(embedding_size=E, hidden_size=H, hidden_pad=Hp,
                        input_pad=Dp, output_size=O, output_pad=Op,
                        num_layers=L)
    return params, cfg, raw


# --------------------------------------------------------------------------
# Pure-JAX f32 reference (PyTorch eval-mode semantics)
# --------------------------------------------------------------------------
def decoder_reference(raw, x_tokens, hidden_state, cell_state):
    H = hidden_state.shape[-1]
    x = raw["embedding"][x_tokens]                # dropout = identity (eval)
    new_h, new_c = [], []
    for l, lp in enumerate(raw["lstm"]):
        gates = (x @ lp["w_ih"].T + hidden_state[l] @ lp["w_hh"].T
                 + lp["b_ih"] + lp["b_hh"])
        i_g = jax.nn.sigmoid(gates[:, 0 * H:1 * H])
        f_g = jax.nn.sigmoid(gates[:, 1 * H:2 * H])
        g_g = jnp.tanh(gates[:, 2 * H:3 * H])
        o_g = jax.nn.sigmoid(gates[:, 3 * H:4 * H])
        c = f_g * cell_state[l] + i_g * g_g
        h = o_g * jnp.tanh(c)
        new_h.append(h)
        new_c.append(c)
        x = h
    preds = x @ raw["fc_w"].T + raw["fc_b"]
    return preds, jnp.stack(new_h), jnp.stack(new_c)


# --------------------------------------------------------------------------
# Demo
# --------------------------------------------------------------------------
if __name__ == "__main__":
    INPUT_SIZE = 50        # vocab
    EMBEDDING_SIZE = 32
    HIDDEN_SIZE = 32
    NUM_LAYERS = 2
    OUTPUT_SIZE = 48
    BATCH = 8
    DROPOUT_P = 0.5        # eval-mode dropout == identity

    root = jax.random.PRNGKey(0)
    k_params, k_tok, k_h, k_c = jax.random.split(root, 4)

    params, cfg, raw = init_decoder_params(
        k_params, INPUT_SIZE, EMBEDDING_SIZE, HIDDEN_SIZE, NUM_LAYERS,
        OUTPUT_SIZE, dropout_p=DROPOUT_P)

    x_tokens = jax.random.randint(k_tok, (BATCH,), 0, INPUT_SIZE, jnp.int32)
    hidden_state = jax.random.normal(k_h, (NUM_LAYERS, BATCH, HIDDEN_SIZE),
                                     jnp.float32)
    cell_state = jax.random.normal(k_c, (NUM_LAYERS, BATCH, HIDDEN_SIZE),
                                   jnp.float32)

    decode = jax.jit(decoder_forward, static_argnums=1)
    preds, h_out, c_out = decode(params, cfg, x_tokens, hidden_state, cell_state)
    jax.block_until_ready((preds, h_out, c_out))

    assert preds.shape == (BATCH, OUTPUT_SIZE)
    assert h_out.shape == (NUM_LAYERS, BATCH, HIDDEN_SIZE)
    assert c_out.shape == (NUM_LAYERS, BATCH, HIDDEN_SIZE)

    # Sanity check against a pure-JAX f32 reference (bf16 weights in the
    # kernel -> loose tolerance).
    ref_p, ref_h, ref_c = decoder_reference(raw, x_tokens, hidden_state, cell_state)
    assert jnp.allclose(preds, ref_p, atol=5e-2, rtol=5e-2), \
        float(jnp.max(jnp.abs(preds - ref_p)))
    assert jnp.allclose(h_out, ref_h, atol=5e-2, rtol=5e-2), \
        float(jnp.max(jnp.abs(h_out - ref_h)))
    assert jnp.allclose(c_out, ref_c, atol=5e-2, rtol=5e-2), \
        float(jnp.max(jnp.abs(c_out - ref_c)))

    print("KERNEL_OK")
</pallas_src>

<mosaic_0001>
module attributes {stable_mosaic.version = 11 : i64} {
  func.func @_decoder_step_kernel(%arg0: i32, %arg1: memref<8xi32, #tpu.memory_space<smem>>, %arg2: memref<56x128xf32, #tpu.memory_space<vmem>>, %arg3: memref<1x8x128xf32, #tpu.memory_space<vmem>>, %arg4: memref<1x8x128xf32, #tpu.memory_space<vmem>>, %arg5: memref<1x256x512xbf16, #tpu.memory_space<vmem>>, %arg6: memref<1x1x512xf32, #tpu.memory_space<vmem>>, %arg7: memref<128x128xbf16, #tpu.memory_space<vmem>>, %arg8: memref<1x128xf32, #tpu.memory_space<vmem>>, %arg9: memref<1x8x128xf32, #tpu.memory_space<vmem>>, %arg10: memref<1x8x128xf32, #tpu.memory_space<vmem>>, %arg11: memref<8x128xf32, #tpu.memory_space<vmem>>, %arg12: memref<8x256xf32, #tpu.memory_space<vmem>>) attributes {dimension_semantics = [#tpu.dimension_semantics<arbitrary>], iteration_bounds = array<i64: 2>, scalar_prefetch = 1 : i64, scratch_operands = 1 : i64, tpu.core_type = #tpu.core_type<tc>, window_params = [{pipeline_mode = #tpu.pipeline_mode<synchronous>, transform_indices = @transform_0, window_bounds = array<i64: 56, 128>}, {transform_indices = @transform_1, window_bounds = array<i64: 1, 8, 128>}, {transform_indices = @transform_2, window_bounds = array<i64: 1, 8, 128>}, {transform_indices = @transform_3, window_bounds = array<i64: 1, 256, 512>}, {transform_indices = @transform_4, window_bounds = array<i64: 1, 1, 512>}, {pipeline_mode = #tpu.pipeline_mode<synchronous>, transform_indices = @transform_5, window_bounds = array<i64: 128, 128>}, {pipeline_mode = #tpu.pipeline_mode<synchronous>, transform_indices = @transform_6, window_bounds = array<i64: 1, 128>}, {transform_indices = @transform_7, window_bounds = array<i64: 1, 8, 128>}, {transform_indices = @transform_8, window_bounds = array<i64: 1, 8, 128>}, {pipeline_mode = #tpu.pipeline_mode<synchronous>, transform_indices = @transform_9, window_bounds = array<i64: 8, 128>}]} {
    %c0_i32 = arith.constant 0 : i32
    %0 = arith.cmpi eq, %arg0, %c0_i32 : i32
    %1 = arith.extui %0 : i1 to i32
    %c0_i32_0 = arith.constant 0 : i32
    %2 = arith.cmpi ne, %1, %c0_i32_0 : i32
    scf.if %2 {
      %c0_27 = arith.constant 0 : index
      %52 = memref.load %arg1[%c0_27] : memref<8xi32, #tpu.memory_space<smem>>
      %53 = arith.index_cast %52 : i32 to index
      %c0_28 = arith.constant 0 : index
      %54 = vector.load %arg2[%53, %c0_28] : memref<56x128xf32, #tpu.memory_space<vmem>>, vector<1x128xf32>
      %c0_29 = arith.constant 0 : index
      %c0_30 = arith.constant 0 : index
      %55 = vector.load %arg12[%c0_29, %c0_30] : memref<8x256xf32, #tpu.memory_space<vmem>>, vector<1x128xf32>
      tpu.vector_store %arg12[%c0_29, %c0_30], %54 {strides = array<i32>} : memref<8x256xf32, #tpu.memory_space<vmem>>, vector<1x128xf32>,
      %c1 = arith.constant 1 : index
      %56 = memref.load %arg1[%c1] : memref<8xi32, #tpu.memory_space<smem>>
      %57 = arith.index_cast %56 : i32 to index
      %c0_31 = arith.constant 0 : index
      %58 = vector.load %arg2[%57, %c0_31] : memref<56x128xf32, #tpu.memory_space<vmem>>, vector<1x128xf32>
      %c1_32 = arith.constant 1 : index
      %c0_33 = arith.constant 0 : index
      %59 = vector.load %arg12[%c1_32, %c0_33] : memref<8x256xf32, #tpu.memory_space<vmem>>, vector<1x128xf32>
      tpu.vector_store %arg12[%c1_32, %c0_33], %58 {strides = array<i32>} : memref<8x256xf32, #tpu.memory_space<vmem>>, vector<1x128xf32>,
      %c2 = arith.constant 2 : index
      %60 = memref.load %arg1[%c2] : memref<8xi32, #tpu.memory_space<smem>>
      %61 = arith.index_cast %60 : i32 to index
      %c0_34 = arith.constant 0 : index
      %62 = vector.load %arg2[%61, %c0_34] : memref<56x128xf32, #tpu.memory_space<vmem>>, vector<1x128xf32>
      %c2_35 = arith.constant 2 : index
      %c0_36 = arith.constant 0 : index
      %63 = vector.load %arg12[%c2_35, %c0_36] : memref<8x256xf32, #tpu.memory_space<vmem>>, vector<1x128xf32>
      tpu.vector_store %arg12[%c2_35, %c0_36], %62 {strides = array<i32>} : memref<8x256xf32, #tpu.memory_space<vmem>>, vector<1x128xf32>,
      %c3 = arith.constant 3 : index
      %64 = memref.load %arg1[%c3] : memref<8xi32, #tpu.memory_space<smem>>
      %65 = arith.index_cast %64 : i32 to index
      %c0_37 = arith.constant 0 : index
      %66 = vector.load %arg2[%65, %c0_37] : memref<56x128xf32, #tpu.memory_space<vmem>>, vector<1x128xf32>
      %c3_38 = arith.constant 3 : index
      %c0_39 = arith.constant 0 : index
      %67 = vector.load %arg12[%c3_38, %c0_39] : memref<8x256xf32, #tpu.memory_space<vmem>>, vector<1x128xf32>
      tpu.vector_store %arg12[%c3_38, %c0_39], %66 {strides = array<i32>} : memref<8x256xf32, #tpu.memory_space<vmem>>, vector<1x128xf32>,
      %c4 = arith.constant 4 : index
      %68 = memref.load %arg1[%c4] : memref<8xi32, #tpu.memory_space<smem>>
      %69 = arith.index_cast %68 : i32 to index
      %c0_40 = arith.constant 0 : index
      %70 = vector.load %arg2[%69, %c0_40] : memref<56x128xf32, #tpu.memory_space<vmem>>, vector<1x128xf32>
      %c4_41 = arith.constant 4 : index
      %c0_42 = arith.constant 0 : index
      %71 = vector.load %arg12[%c4_41, %c0_42] : memref<8x256xf32, #tpu.memory_space<vmem>>, vector<1x128xf32>
      tpu.vector_store %arg12[%c4_41, %c0_42], %70 {strides = array<i32>} : memref<8x256xf32, #tpu.memory_space<vmem>>, vector<1x128xf32>,
      %c5 = arith.constant 5 : index
      %72 = memref.load %arg1[%c5] : memref<8xi32, #tpu.memory_space<smem>>
      %73 = arith.index_cast %72 : i32 to index
      %c0_43 = arith.constant 0 : index
      %74 = vector.load %arg2[%73, %c0_43] : memref<56x128xf32, #tpu.memory_space<vmem>>, vector<1x128xf32>
      %c5_44 = arith.constant 5 : index
      %c0_45 = arith.constant 0 : index
      %75 = vector.load %arg12[%c5_44, %c0_45] : memref<8x256xf32, #tpu.memory_space<vmem>>, vector<1x128xf32>
      tpu.vector_store %arg12[%c5_44, %c0_45], %74 {strides = array<i32>} : memref<8x256xf32, #tpu.memory_space<vmem>>, vector<1x128xf32>,
      %c6 = arith.constant 6 : index
      %76 = memref.load %arg1[%c6] : memref<8xi32, #tpu.memory_space<smem>>
      %77 = arith.index_cast %76 : i32 to index
      %c0_46 = arith.constant 0 : index
      %78 = vector.load %arg2[%77, %c0_46] : memref<56x128xf32, #tpu.memory_space<vmem>>, vector<1x128xf32>
      %c6_47 = arith.constant 6 : index
      %c0_48 = arith.constant 0 : index
      %79 = vector.load %arg12[%c6_47, %c0_48] : memref<8x256xf32, #tpu.memory_space<vmem>>, vector<1x128xf32>
      tpu.vector_store %arg12[%c6_47, %c0_48], %78 {strides = array<i32>} : memref<8x256xf32, #tpu.memory_space<vmem>>, vector<1x128xf32>,
      %c7 = arith.constant 7 : index
      %80 = memref.load %arg1[%c7] : memref<8xi32, #tpu.memory_space<smem>>
      %81 = arith.index_cast %80 : i32 to index
      %c0_49 = arith.constant 0 : index
      %82 = vector.load %arg2[%81, %c0_49] : memref<56x128xf32, #tpu.memory_space<vmem>>, vector<1x128xf32>
      %c7_50 = arith.constant 7 : index
      %c0_51 = arith.constant 0 : index
      %83 = vector.load %arg12[%c7_50, %c0_51] : memref<8x256xf32, #tpu.memory_space<vmem>>, vector<1x128xf32>
      tpu.vector_store %arg12[%c7_50, %c0_51], %82 {strides = array<i32>} : memref<8x256xf32, #tpu.memory_space<vmem>>, vector<1x128xf32>,
    } else {
    }
    %c0 = arith.constant 0 : index
    %c0_1 = arith.constant 0 : index
    %c0_2 = arith.constant 0 : index
    %3 = vector.load %arg3[%c0, %c0_1, %c0_2] : memref<1x8x128xf32, #tpu.memory_space<vmem>>, vector<1x8x128xf32>
    %4 = vector.shape_cast %3 : vector<1x8x128xf32> to vector<8x128xf32>
    %c0_3 = arith.constant 0 : index
    %c128 = arith.constant 128 : index
    %5 = vector.load %arg12[%c0_3, %c128] : memref<8x256xf32, #tpu.memory_space<vmem>>, vector<8x128xf32>
    tpu.vector_store %arg12[%c0_3, %c128], %4 {strides = array<i32>} : memref<8x256xf32, #tpu.memory_space<vmem>>, vector<8x128xf32>,
    %c0_4 = arith.constant 0 : index
    %c0_5 = arith.constant 0 : index
    %6 = vector.load %arg12[%c0_4, %c0_5] : memref<8x256xf32, #tpu.memory_space<vmem>>, vector<8x256xf32>
    %7 = arith.truncf %6 : vector<8x256xf32> to vector<8x256xbf16>
    %c0_6 = arith.constant 0 : index
    %c0_7 = arith.constant 0 : index
    %c0_8 = arith.constant 0 : index
    %8 = vector.load %arg5[%c0_6, %c0_7, %c0_8] : memref<1x256x512xbf16, #tpu.memory_space<vmem>>, vector<1x256x512xbf16>
    %9 = vector.shape_cast %8 : vector<1x256x512xbf16> to vector<256x512xbf16>
    %cst = arith.constant dense<0.000000e+00> : vector<8x512xf32>
    %10 = tpu.matmul %7, %9, %cst {dimension_numbers = #tpu.dot_dimension_numbers<[1], [0], [0], [1], [0, 0, 1, 1], [], []>} : vector<8x256xbf16>, vector<256x512xbf16>, vector<8x512xf32> -> vector<8x512xf32>
    %c0_9 = arith.constant 0 : index
    %c0_10 = arith.constant 0 : index
    %c0_11 = arith.constant 0 : index
    %11 = vector.load %arg6[%c0_9, %c0_10, %c0_11] : memref<1x1x512xf32, #tpu.memory_space<vmem>>, vector<1x1x512xf32>
    %12 = vector.shape_cast %11 : vector<1x1x512xf32> to vector<1x512xf32>
    %13 = vector.broadcast %12 : vector<1x512xf32> to vector<8x512xf32>
    %14 = arith.addf %10, %13 : vector<8x512xf32>
    %15 = vector.extract_strided_slice %14 {offsets = [0, 0], sizes = [8, 128], strides = [1, 1]} : vector<8x512xf32> to vector<8x128xf32>
    %16 = arith.negf %15 : vector<8x128xf32>
    %17 = math.exp %16 : vector<8x128xf32>
    %cst_12 = arith.constant 1.000000e+00 : f32
    %18 = vector.broadcast %cst_12 : f32 to vector<8x128xf32>
    %19 = arith.addf %18, %17 : vector<8x128xf32>
    %20 = arith.divf %18, %19 : vector<8x128xf32>
    %21 = vector.extract_strided_slice %14 {offsets = [0, 128], sizes = [8, 128], strides = [1, 1]} : vector<8x512xf32> to vector<8x128xf32>
    %22 = arith.negf %21 : vector<8x128xf32>
    %23 = math.exp %22 : vector<8x128xf32>
    %cst_13 = arith.constant 1.000000e+00 : f32
    %24 = vector.broadcast %cst_13 : f32 to vector<8x128xf32>
    %25 = arith.addf %24, %23 : vector<8x128xf32>
    %26 = arith.divf %24, %25 : vector<8x128xf32>
    %27 = vector.extract_strided_slice %14 {offsets = [0, 256], sizes = [8, 128], strides = [1, 1]} : vector<8x512xf32> to vector<8x128xf32>
    %28 = math.tanh %27 : vector<8x128xf32>
    %29 = vector.extract_strided_slice %14 {offsets = [0, 384], sizes = [8, 128], strides = [1, 1]} : vector<8x512xf32> to vector<8x128xf32>
    %30 = arith.negf %29 : vector<8x128xf32>
    %31 = math.exp %30 : vector<8x128xf32>
    %cst_14 = arith.constant 1.000000e+00 : f32
    %32 = vector.broadcast %cst_14 : f32 to vector<8x128xf32>
    %33 = arith.addf %32, %31 : vector<8x128xf32>
    %34 = arith.divf %32, %33 : vector<8x128xf32>
    %c0_15 = arith.constant 0 : index
    %c0_16 = arith.constant 0 : index
    %c0_17 = arith.constant 0 : index
    %35 = vector.load %arg4[%c0_15, %c0_16, %c0_17] : memref<1x8x128xf32, #tpu.memory_space<vmem>>, vector<1x8x128xf32>
    %36 = vector.shape_cast %35 : vector<1x8x128xf32> to vector<8x128xf32>
    %37 = arith.mulf %26, %36 : vector<8x128xf32>
    %38 = arith.mulf %20, %28 : vector<8x128xf32>
    %39 = arith.addf %37, %38 : vector<8x128xf32>
    %40 = math.tanh %39 : vector<8x128xf32>
    %41 = arith.mulf %34, %40 : vector<8x128xf32>
    %c0_18 = arith.constant 0 : index
    %c0_19 = arith.constant 0 : index
    %c0_20 = arith.constant 0 : index
    %42 = vector.load %arg9[%c0_18, %c0_19, %c0_20] : memref<1x8x128xf32, #tpu.memory_space<vmem>>, vector<1x8x128xf32>
    %43 = vector.shape_cast %42 : vector<1x8x128xf32> to vector<8x128xf32>
    %44 = vector.shape_cast %41 : vector<8x128xf32> to vector<1x8x128xf32>
    tpu.vector_store %arg9[%c0_18, %c0_19, %c0_20], %44 {strides = array<i32>} : memref<1x8x128xf32, #tpu.memory_space<vmem>>, vector<1x8x128xf32>,
    %c0_21 = arith.constant 0 : index
    %c0_22 = arith.constant 0 : index
    %c0_23 = arith.constant 0 : index
    %45 = vector.load %arg10[%c0_21, %c0_22, %c0_23] : memref<1x8x128xf32, #tpu.memory_space<vmem>>, vector<1x8x128xf32>
    %46 = vector.shape_cast %45 : vector<1x8x128xf32> to vector<8x128xf32>
    %47 = vector.shape_cast %39 : vector<8x128xf32> to vector<1x8x128xf32>
    tpu.vector_store %arg10[%c0_21, %c0_22, %c0_23], %47 {strides = array<i32>} : memref<1x8x128xf32, #tpu.memory_space<vmem>>, vector<1x8x128xf32>,
    %c0_24 = arith.constant 0 : index
    %c0_25 = arith.constant 0 : index
    %48 = vector.load %arg12[%c0_24, %c0_25] : memref<8x256xf32, #tpu.memory_space<vmem>>, vector<8x128xf32>
    tpu.vector_store %arg12[%c0_24, %c0_25], %41 {strides = array<i32>} : memref<8x256xf32, #tpu.memory_space<vmem>>, vector<8x128xf32>,
    %c1_i32 = arith.constant 1 : i32
    %49 = arith.cmpi eq, %arg0, %c1_i32 : i32
    %50 = arith.extui %49 : i1 to i32
    %c0_i32_26 = arith.constant 0 : i32
    %51 = arith.cmpi ne, %50, %c0_i32_26 : i32
    scf.if %51 {
      %52 = arith.truncf %41 : vector<8x128xf32> to vector<8x128xbf16>
      %c0_27 = arith.constant 0 : index
      %c0_28 = arith.constant 0 : index
      %53 = vector.load %arg7[%c0_27, %c0_28] : memref<128x128xbf16, #tpu.memory_space<vmem>>, vector<128x128xbf16>
      %cst_29 = arith.constant dense<0.000000e+00> : vector<8x128xf32>
      %54 = tpu.matmul %52, %53, %cst_29 {dimension_numbers = #tpu.dot_dimension_numbers<[1], [0], [0], [1], [0, 0, 1, 1], [], []>} : vector<8x128xbf16>, vector<128x128xbf16>, vector<8x128xf32> -> vector<8x128xf32>
      %c0_30 = arith.constant 0 : index
      %c0_31 = arith.constant 0 : index
      %55 = vector.load %arg8[%c0_30, %c0_31] : memref<1x128xf32, #tpu.memory_space<vmem>>, vector<1x128xf32>
      %56 = vector.broadcast %55 : vector<1x128xf32> to vector<8x128xf32>
      %57 = arith.addf %54, %56 : vector<8x128xf32>
      %c0_32 = arith.constant 0 : index
      %c0_33 = arith.constant 0 : index
      %58 = vector.load %arg11[%c0_32, %c0_33] : memref<8x128xf32, #tpu.memory_space<vmem>>, vector<8x128xf32>
      tpu.vector_store %arg11[%c0_32, %c0_33], %57 {strides = array<i32>} : memref<8x128xf32, #tpu.memory_space<vmem>>, vector<8x128xf32>,
    } else {
    }
    return
  }
  func.func @transform_0(%arg0: i32, %arg1: memref<8xi32, #tpu.memory_space<smem>>) -> (i32, i32) {
    %c0_i32 = arith.constant 0 : i32
    %c0_i32_0 = arith.constant 0 : i32
    %c0_i32_1 = arith.constant 0 : i32
    return %c0_i32, %c0_i32_0 : i32, i32
  }
  func.func @transform_1(%arg0: i32, %arg1: memref<8xi32, #tpu.memory_space<smem>>) -> (i32, i32, i32) {
    %c0_i32 = arith.constant 0 : i32
    %c0_i32_0 = arith.constant 0 : i32
    %c0_i32_1 = arith.constant 0 : i32
    return %arg0, %c0_i32, %c0_i32_0 : i32, i32, i32
  }
  func.func @transform_2(%arg0: i32, %arg1: memref<8xi32, #tpu.memory_space<smem>>) -> (i32, i32, i32) {
    %c0_i32 = arith.constant 0 : i32
    %c0_i32_0 = arith.constant 0 : i32
    %c0_i32_1 = arith.constant 0 : i32
    return %arg0, %c0_i32, %c0_i32_0 : i32, i32, i32
  }
  func.func @transform_3(%arg0: i32, %arg1: memref<8xi32, #tpu.memory_space<smem>>) -> (i32, i32, i32) {
    %c0_i32 = arith.constant 0 : i32
    %c0_i32_0 = arith.constant 0 : i32
    %c0_i32_1 = arith.constant 0 : i32
    return %arg0, %c0_i32, %c0_i32_0 : i32, i32, i32
  }
  func.func @transform_4(%arg0: i32, %arg1: memref<8xi32, #tpu.memory_space<smem>>) -> (i32, i32, i32) {
    %c0_i32 = arith.constant 0 : i32
    %c0_i32_0 = arith.constant 0 : i32
    %c0_i32_1 = arith.constant 0 : i32
    return %arg0, %c0_i32, %c0_i32_0 : i32, i32, i32
  }
  func.func @transform_5(%arg0: i32, %arg1: memref<8xi32, #tpu.memory_space<smem>>) -> (i32, i32) {
    %c0_i32 = arith.constant 0 : i32
    %c0_i32_0 = arith.constant 0 : i32
    %c0_i32_1 = arith.constant 0 : i32
    return %c0_i32, %c0_i32_0 : i32, i32
  }
  func.func @transform_6(%arg0: i32, %arg1: memref<8xi32, #tpu.memory_space<smem>>) -> (i32, i32) {
    %c0_i32 = arith.constant 0 : i32
    %c0_i32_0 = arith.constant 0 : i32
    %c0_i32_1 = arith.constant 0 : i32
    return %c0_i32, %c0_i32_0 : i32, i32
  }
  func.func @transform_7(%arg0: i32, %arg1: memref<8xi32, #tpu.memory_space<smem>>) -> (i32, i32, i32) {
    %c0_i32 = arith.constant 0 : i32
    %c0_i32_0 = arith.constant 0 : i32
    %c0_i32_1 = arith.constant 0 : i32
    return %arg0, %c0_i32, %c0_i32_0 : i32, i32, i32
  }
  func.func @transform_8(%arg0: i32, %arg1: memref<8xi32, #tpu.memory_space<smem>>) -> (i32, i32, i32) {
    %c0_i32 = arith.constant 0 : i32
    %c0_i32_0 = arith.constant 0 : i32
    %c0_i32_1 = arith.constant 0 : i32
    return %arg0, %c0_i32, %c0_i32_0 : i32, i32, i32
  }
  func.func @transform_9(%arg0: i32, %arg1: memref<8xi32, #tpu.memory_space<smem>>) -> (i32, i32) {
    %c0_i32 = arith.constant 0 : i32
    %c0_i32_0 = arith.constant 0 : i32
    %c0_i32_1 = arith.constant 0 : i32
    return %c0_i32, %c0_i32_0 : i32, i32
  }
}

</mosaic_0001>

<bundles_post_ra>
// kernel: decoder_forward.1
= control target key start
LH: loop header
LB: loop body
LE: loop exit
PB: predicated region body
PF: predicated region fallthrough
CT: control target
= control target key end

     0   :  { %s2356_s0 = inlined_call_operand.vmem [shape: s32[8], index: 0, kind: input, shape index: {}]   ;;  %s2357_s1 = inlined_call_operand.hbm [shape: f32[56,128], index: 1, kind: input, shape index: {}]   ;;  %s2358_s2 = inlined_call_operand.vmem [shape: f32[2,8,128], index: 2, kind: input, shape index: {}]   ;;  %s2359_s3 = inlined_call_operand.vmem [shape: f32[2,8,128], index: 3, kind: input, shape index: {}]   ;;  %s2360_s4 = inlined_call_operand.hbm [shape: bf16[2,256,512], index: 4, kind: input, shape index: {}]   ;;  %s2361_s5 = inlined_call_operand.hbm [shape: f32[2,1,512], index: 5, kind: input, shape index: {}]   ;;  %s2362_s6 = inlined_call_operand.vmem [shape: bf16[128,128], index: 6, kind: input, shape index: {}]   ;;  %s2363_s7 = inlined_call_operand.vmem [shape: f32[1,128], index: 7, kind: input, shape index: {}]   ;;  %s2364_s8 = inlined_call_operand.hbm [shape: f32[2,8,128], index: 8, kind: output, shape index: {0}]   ;;  %s2365_s9 = inlined_call_operand.hbm [shape: f32[2,8,128], index: 9, kind: output, shape index: {1}]   ;;  %s2366_s10 = inlined_call_operand.hbm [shape: f32[8,128], index: 10, kind: output, shape index: {2}]  }
   0x1   :  { %2380 = sst [smem:[#allocation26_spill]] %s2357_s1  ;;  %s16_s15 = sshll.u32 %s2356_s0, 4  ;;  %s17_s15 = int_to_ptr.vmem [resolvable:$true] %s16_s15 }
   0x2   :  { %2381 = sst [smem:[#allocation27_spill]] %s2358_s2  ;;  %s1688_s16 = scalar_lea.vmem %s17_s15, 16 }
   0x3   :  { %2382 = sst [smem:[#allocation28_spill]] %s2359_s3  ;;  %p1689_p0 = scmp.ne.s32.totalorder %s17_s15, %s1688_s16 }
   0x4   :  { %2383 = sst [smem:[#allocation29_spill]] %s2360_s4  ;;  %p1693_p1 = scmp.lt.s32.totalorder %s17_s15, %s17_s15 }
   0x5   :  { %2384 = sst [smem:[#allocation30_spill]] %s2361_s5  ;;  %p1694_p2 = scmp.lt.s32.totalorder %s1688_s16, %s1688_s16 }
   0x7   :  { %p1695_p3 = por %p1694_p2, %p1693_p1 }
   0x9   :  { %p1696_p4 = pnand %p1695_p3, %p1689_p0 }
   0xb   :  { %1699 = shalt.err (!%p1696_p4)  }
   0xc   :  { %s1912_s17 = smov [#allocation4]  }
   0xd   :  { %19 = dma.vmem_to_smem %s17_s15, 16, %s1912_s17, [#allocation3] }
   0xe   :  { %1874 = dma.done.wait [#allocation3], 16 }
   0xf   :  { %1875 = vsyncadd [#allocation3], 4294967280 }
  0x10   :  { %21 = sfence }
  0x11   :  { %22 = vsyncpa [#allocation6], 0 }
  0x12   :  { %23 = vsyncpa [#allocation9], 0 }
  0x13   :  { %25 = vsyncpa [#allocation9 + $0x1], 0 }
  0x14   :  { %26 = vsyncpa [#allocation7], 0 }
  0x15   :  { %28 = vsyncpa [#allocation7 + $0x1], 0 }
  0x16   :  { %29 = vsyncpa [#allocation13], 0 }
  0x17   :  { %31 = vsyncpa [#allocation13 + $0x1], 0  ;;  %s1983_s0 = smov 0   ;;  %s1985_s18 = smov 0  }
  0x18   :  { %s1987_s19 = smov 0   ;;  %s1989_s20 = smov 0  }
  0x19 LB: > { %2385 = sst [smem:[#allocation21_spill]] %s1906_s19  ;;  %s2004_s21 = sadd.s32 1, %s1910_s20   ;;  %s1910_s20 = sphi %s1989_s20, %s2418_s20   ;;  %s1906_s19 = sphi %s1987_s19, %s2420_s19   ;;  %s1902_s18 = sphi %s1985_s18, %s2422_s18   ;;  %s1898_s0 = sphi %s1983_s0, %s2421_s0  }
  0x1a   : > { %2386 = sst [smem:[#allocation22_spill]] %s1910_s20  ;;  %s117_s22 = sadd.s32 1, %s1906_s19 }
  0x1b   : > { %2387 = sst [smem:[#allocation23_spill]] %s2004_s21  ;;  %s114_s23 = ssub.s32 %s1910_s20, %s2004_s21 }
  0x1c   : > { %p124_p5 = scmp.ne.s32.totalorder %s1906_s19, %s1902_s18  ;;  %p115_p6 = scmp.eq.s32.totalorder %s114_s23, 0 }
  0x1d   : > { %p125_p7 = scmp.eq.s32.totalorder %s1910_s20, 0  ;;  %p1522_p9 = scmp.lt.s32.totalorder %s1910_s20, 2 }
  0x1e   : > { %s2015_s24 = scalar_select %p115_p6, %s1906_s19, %s117_s22  }
  0x1f   : > { %p126_p10 = por %p125_p7, %p124_p5  ;;  %s328_s25 = sand.u32 1, %s1910_s20  }
  0x20   : > { %2388 = sst [smem:[#allocation24_spill]] %s2015_s24  ;;  %s330_s26 = sand.u32 1, %s1906_s19  }
  0x21   : > { %s1349_s27 = sshll.u32 %s330_s26, 9  ;;  %s1456_s28 = sshll.u32 %s1910_s20, 13 }
  0x22   : > { %s2389_s4 = sld [smem:[#allocation29_spill]]  ;;  %s332_s12 = scalar_lea.vmem [#allocation8], %s1349_s27 }
  0x23   : > { %s339_s13 = sshll.u32 %s332_s12, 4  ;;  %p2030_p11 = pnand %p1522_p9, %p126_p10  ;;  %s2034_s13 = int_to_ptr.vmem [resolvable:$true] %s339_s13 }
  0x24   : > { %s2036_s15 = scalar_lea.sflag [#allocation9], %s328_s25 }
  0x25   : > { %p2367_p13 = pneg %p2030_p11 }
  0x28   : > { %s2028_s11 = scalar_lea.hbm %s2389_s4, %s1456_s28  ;;  %s1705_s23 = scalar_lea.hbm %s2389_s4, 16384 }
  0x29   : > { %s1700_s16 = scalar_lea.hbm %s2028_s11, 8192  ;;  %p1706_p2 = scmp.lt.s32.totalorder %s2028_s11, %s2389_s4 }
  0x2a   : > { %p1701_p12 = scmp.ne.s32.totalorder %s2028_s11, %s1700_s16  ;;  %p1707_p3 = scmp.lt.s32.totalorder %s1705_s23, %s1700_s16 }
  0x2c   : > { %p1703_p0 = pnand %p2367_p13, %p1701_p12  ;;  %p1708_p4 = por %p1707_p3, %p1706_p2 }
  0x2e   : > { %p1704_p1 = pneg %p1703_p0 }
  0x30   : > { %p1709_p6 = pnand %p1708_p4, %p1704_p1 }
  0x32   : > { %1712 = shalt.err (!%p1709_p6)
}
  0x33   : > { %s1713_s25 = scalar_lea.vmem %s2034_s13, 8192  ;;  %s1913_s29 = smov [#allocation8]  }
  0x34   : > { %p1714_p7 = scmp.ne.s32.totalorder %s2034_s13, %s1713_s25  ;;  %s1718_s30 = sshll.u32 %s1913_s29, 4  ;;  %s1719_s30 = int_to_ptr.vmem [resolvable:$false] %s1718_s30 }
  0x35   : > { %s1720_s12 = scalar_lea.vmem %s1719_s30, 16384  ;;  %p1721_p12 = scmp.lt.s32.totalorder %s2034_s13, %s1719_s30 }
  0x36   : > { %p1716_p9 = pnand %p1714_p7, %p2367_p13  ;;  %p1722_p0 = scmp.lt.s32.totalorder %s1720_s12, %s1713_s25 }
  0x38   : > { %p1717_p10 = pneg %p1716_p9  ;;  %p1723_p8 = por %p1722_p0, %p1721_p12 }
  0x3a   : > { %p1724_p2 = pnand %p1723_p8, %p1717_p10 }
  0x3c   : > { %1727 = shalt.err (!%p1724_p2)
}
  0x3d   : > { %s1914_s16 = smov 256   ;;  %s1915_s17 = smov 16  }
  0x3e   : > { %1510 = dma.hbm_to_vmem [thread:$0]  (!%p2030_p11), %s2028_s11, 8192, %s2034_s13, %s2036_s15, %s1914_s16, %s1914_s16, %s1915_s17  }
  0x3f   : > { %s2064_s22 = sadd.s32 4294967295, %s1910_s20   ;;  %s2368_s23 = sadd.s32 4294967294, %s1910_s20  }
  0x40   : > { %p130_p8 = scmp.ne.s32.totalorder %s1902_s18, %s1898_s0  ;;  %p2372_p1 = scmp.eq.s32.totalorder %s2064_s22, 0 }
  0x41   : > { %p2371_p3 = scmp.eq.s32.totalorder %s2064_s22, 1  ;;  %p228_p4 = scmp.eq.s32.totalorder %s2368_s23, 1 }
  0x42   : > { %p2075_p6 = por %p2372_p1, %p130_p8  ;;  %p1346_p7 = scmp.ge.s32.totalorder %s1910_s20, 1 }
  0x43   : > { %p2085_p9 = por %p2371_p3, %p124_p5  ;;  %p2089_p10 = por %p228_p4, %p130_p8 }
  0x44   : > { %s2391_s27 = scalar_select %p2075_p6, 1, 0 }
  0x45   : > { %s2392_s11 = scalar_select %p2085_p9, 1, 0 }
  0x46   : > { %s2393_s13 = scalar_select %p2089_p10, 1, 0 }
  0x47   : > { %p282_p12 = scmp.lt.s32.totalorder %s1910_s20, 3  ;;  %s1916_s25 = smov [#allocation5]  }
  0x48   : > { %2394 = sst [smem:[#allocation25_spill]] %s2393_s13  ;;  %s294_s29 = sshll.u32 %s1916_s25, 4  ;;  %s295_s29 = int_to_ptr.vmem [resolvable:$true] %s294_s29 }
  0x49   : > { %p2095_p2 = pnand %p1346_p7, %p282_p12  ;;  %s1352_s30 = sshll.u32 %s330_s26, 2 }
  0x4a   : > { %s1457_s12 = sshll.u32 %s1910_s20, 6  ;;  %s2397_s5 = sld [smem:[#allocation30_spill]] }
  0x4b   : > { %p1503_p13 = pneg %p2095_p2  ;;  %s353_s24 = scalar_lea.vmem [#allocation10], %s1352_s30 }
  0x4c   : > { %s361_s21 = sshll.u32 %s353_s24, 4  ;;  %s1739_s25 = scalar_lea.vmem %s295_s29, 896  ;;  %s2115_s21 = int_to_ptr.vmem [resolvable:$true] %s361_s21 }
  0x4d   : > { %p2106_p5 = pnand %p1503_p13, %p2372_p1  ;;  %p1740_p4 = scmp.ne.s32.totalorder %s295_s29, %s1739_s25 }
  0x4e   : > { %p1747_p13 = scmp.lt.s32.totalorder %s295_s29, %s295_s29  ;;  %p1748_p3 = scmp.lt.s32.totalorder %s1739_s25, %s1739_s25 }
  0x4f   : > { %p1730_p8 = pneg %p2106_p5 }
  0x50   : > { %s2113_s4 = scalar_lea.hbm %s2397_s5, %s1457_s12  ;;  %p1749_p0 = por %p1748_p3, %p1747_p13 }
  0x51   : > { %p1742_p7 = pnand %p1740_p4, %p1730_p8 }
  0x53   : > { %p1743_p12 = pneg %p1742_p7 }
  0x55   : > { %p1750_p1 = pnand %p1749_p0, %p1743_p12 }
  0x57   : > { %1753 = shalt.err (!%p1750_p1)
}
  0x58   : > { %s1917_s26 = smov 128   ;;  %s1918_s24 = smov 8  }
  0x59   : > { %s2398_s1 = sld [smem:[#allocation26_spill]]  ;;  %s1754_s12 = scalar_lea.hbm %s2113_s4, 64 }
  0x5a   : > { %p1755_p8 = scmp.ne.s32.totalorder %s2113_s4, %s1754_s12  ;;  %p2399_p4 = pneg %p2030_p11 }
  0x5b   : > { %s1759_s19 = scalar_lea.hbm %s2397_s5, 128  ;;  %p1760_p1 = scmp.lt.s32.totalorder %s2113_s4, %s2397_s5 }
  0x5c   : > { %p1757_p7 = pnand %p1755_p8, %p2399_p4  ;;  %p1761_p0 = scmp.lt.s32.totalorder %s1759_s19, %s1754_s12 }
  0x5e   : > { %p1758_p3 = pneg %p1757_p7  ;;  %p1762_p12 = por %p1761_p0, %p1760_p1 }
  0x5f   : > { %1506 = dma.hbm_to_vmem [thread:$0]  (!%p2106_p5), %s2398_s1, 896, %s295_s29, [#allocation6], %s1917_s26, %s1917_s26, %s1918_s24  }
  0x60   : > { %p1763_p13 = pnand %p1762_p12, %p1758_p3 }
  0x62   : > { %1766 = shalt.err (!%p1763_p13)
}
  0x63   : > { %s1767_s29 = scalar_lea.vmem %s2115_s21, 64  ;;  %p2400_p8 = pmov %p2399_p4 }
  0x64   : > { %p1768_p5 = scmp.ne.s32.totalorder %s2115_s21, %s1767_s29  ;;  %s1919_s16 = smov [#allocation10]  }
  0x65   : > { %s1772_s26 = sshll.u32 %s1919_s16, 4  ;;  %s1773_s26 = int_to_ptr.vmem [resolvable:$false] %s1772_s26 }
  0x66   : > { %p1770_p4 = pnand %p1768_p5, %p2400_p8  ;;  %s1774_s24 = scalar_lea.vmem %s1773_s26, 128 }
  0x67   : > { %p1775_p10 = scmp.lt.s32.totalorder %s2115_s21, %s1773_s26  ;;  %p1776_p9 = scmp.lt.s32.totalorder %s1774_s24, %s1767_s29 }
  0x68   : > { %p1771_p7 = pneg %p1770_p4 }
  0x69   : > { %p1777_p6 = por %p1776_p9, %p1775_p10 }
  0x6b   : > { %p1778_p1 = pnand %p1777_p6, %p1771_p7 }
  0x6d   : > { %1781 = shalt.err (!%p1778_p1)
}
  0x6e   : > { %1513 = dma.hbm_to_vmem [thread:$0]  (!%p2030_p11), %s2113_s4, 64, %s2115_s21, %s2036_s15  }
  0x6f   : > { %370 = sbr.rel (%p2095_p2) target bundleno = 759 (0x2f7), region = 48  ;;  %p2401_p3 = scmp.eq.s32.totalorder (!%p2095_p2), %s2064_s22, 0 }
  0x74   : > { %1877 = dma.done.wait (%p2401_p3), [#allocation6], 896   ;;  %p2402_p0 = pmov %p2401_p3 }
  0x75   : > { %s2379_s19 = sand.u32 1, %s2064_s22   ;;  %s2155_s20 = sand.u32 1, %s1902_s18  }
  0x76   : > { %1879 = vsyncadd (%p2402_p0), [#allocation6], 4294966400  ;;  %s1357_s14 = sshll.u32 %s2155_s20, 9  ;;  %s377_s4 = scalar_lea.sflag [#allocation9], %s2379_s19 }
  0x77   : > { %s2160_s21 = scalar_lea.vmem [#allocation8], %s1357_s14  ;;  %p2403_p11 = scmp.ne.s32.totalorder %s2391_s27, 0 }
  0x79   : > { %1881 = dma.done.wait (%p2403_p11), %s377_s4, 8256  }
  0x7a   : > { %1883 = vsyncadd (%p2403_p11), %s377_s4, 4294959040  ;;  %s1358_s15 = sshll.u32 %s2155_s20, 2  ;;  %s1359_s13 = sshll.u32 %s2155_s20, 3 }
  0x7b   : > { %p442_p6 = scmp.lt.s32.totalorder %s2064_s22, 1  ;;  %s2404_s2 = sld [smem:[#allocation27_spill]] }
  0x7c   : > { %s2405_s3 = sld [smem:[#allocation28_spill]]  ;;  %s2180_s27 = scalar_lea.vmem [#allocation10], %s1358_s15 }
  0x7d   : > { %s443_s28 = scalar_select %p442_p6, %s2064_s22, 1 }
  0x7e   : > { %s2182_s26 = scalar_lea.vmem [#allocation11], %s1359_s13  ;;  %s2184_s24 = scalar_lea.vmem [#allocation12], %s1359_s13 }
  0x7f   : > { %s1361_s23 = sshll.u32 %s443_s28, 3  ;;  %p2406_p9 = scmp.ne.s32.totalorder %s2064_s22, 0 }
  0x80   : > { %s455_s14 = sld [smem:[#allocation4]] (!%p2406_p9) }
  0x81   : > { %s2173_s17 = scalar_lea.vmem %s2404_s2, %s1361_s23  ;;  %454 = sbr.rel (%p2406_p9) target bundleno = 145 (0x91), region = 64 }
  0x82   : > { %s2178_s16 = scalar_lea.vmem %s2405_s3, %s1361_s23  ;;  %s1364_s4 = sld [smem:[#allocation4 + $0x1]] (!%p2406_p9) }
  0x83   : > { %s1365_s28 = sld [smem:[#allocation4 + $0x2]] (!%p2406_p9) }
  0x84   : > { %s1366_s30 = sld [smem:[#allocation4 + $0x3]] (!%p2406_p9) }
  0x85   : > { %s1367_s12 = sld [smem:[#allocation4 + $0x4]] (!%p2406_p9) }
  0x86   : > { %s1368_s19 = sld [smem:[#allocation4 + $0x5]]  ;;  %s456_s2 = scalar_lea.vmem [#allocation5], %s455_s14 }
  0x87   : > { %s1369_s1 = sld [smem:[#allocation4 + $0x6]]  ;;  %v457_v0 = vld [vmem:[%s456_s2] sm:$0x1] }
  0x88   : > { %s1370_s23 = sld [smem:[#allocation4 + $0x7]]  ;;  %458 = vst [vmem:[#allocation2] sm:$0x1] %v457_v0  ;;  %s460_s15 = scalar_lea.vmem [#allocation5], %s1364_s4 }
  0x89   : > { %v461_v1 = vld [vmem:[%s460_s15] sm:$0x1]  ;;  %s464_s25 = scalar_lea.vmem [#allocation5], %s1365_s28 }
  0x8a   : > { %462 = vst [vmem:[#allocation2 + $0x1] sm:$0x1] %v461_v1  ;;  %v465_v2 = vld [vmem:[%s464_s25] sm:$0x1]  ;;  %s468_s13 = scalar_lea.vmem [#allocation5], %s1366_s30 }
  0x8b   : > { %466 = vst [vmem:[#allocation2 + $0x2] sm:$0x1] %v465_v2  ;;  %v469_v3 = vld [vmem:[%s468_s13] sm:$0x1]  ;;  %s472_s29 = scalar_lea.vmem [#allocation5], %s1367_s12 }
  0x8c   : > { %470 = vst [vmem:[#allocation2 + $0x3] sm:$0x1] %v469_v3  ;;  %v473_v4 = vld [vmem:[%s472_s29] sm:$0x1]  ;;  %s476_s3 = scalar_lea.vmem [#allocation5], %s1368_s19 }
  0x8d   : > { %474 = vst [vmem:[#allocation2 + $0x4] sm:$0x1] %v473_v4  ;;  %v477_v5 = vld [vmem:[%s476_s3] sm:$0x1]  ;;  %s480_s5 = scalar_lea.vmem [#allocation5], %s1369_s1 }
  0x8e   : > { %478 = vst [vmem:[#allocation2 + $0x5] sm:$0x1] %v477_v5  ;;  %v481_v6 = vld [vmem:[%s480_s5] sm:$0x1]  ;;  %s484_s2 = scalar_lea.vmem [#allocation5], %s1370_s23 }
  0x8f   : > { %482 = vst [vmem:[#allocation2 + $0x6] sm:$0x1] %v481_v6  ;;  %v485_v7 = vld [vmem:[%s484_s2] sm:$0x1] }
  0x90   : > { %486 = vst [vmem:[#allocation2 + $0x7] sm:$0x1] %v485_v7 }
  0x91 PF: > { %v1568_v8 = vld [vmem:[%s2160_s21 + $0xe4] ss:$16 sps:$4 sm:$0xff]   ;;  %v1570_v9 = vld [vmem:[%s2160_s21 + $0xe0] ss:$16 sps:$4 sm:$0xff]   ;;  %v1579_v13 = vld [vmem:[%s2160_s21 + $0xec] ss:$16 sps:$4 sm:$0xff]  }
  0x92   : > { %899 = vmatprep.subr.bf16.mxu0 %v1568_v8  ;;  %v1571_v10 = vld [vmem:[%s2160_s21 + $0xc4] ss:$16 sps:$4 sm:$0xff]   ;;  %v1573_v11 = vld [vmem:[%s2160_s21 + $0xc0] ss:$16 sps:$4 sm:$0xff]   ;;  %v1582_v14 = vld [vmem:[%s2160_s21 + $0xe8] ss:$16 sps:$4 sm:$0xff]   ;;  %940 = vmatprep.subr.bf16.mxu1 %v1579_v13 }
  0x93   : > { %900 = vmatpush1.bf16.msra.mxu0 %v1570_v9  ;;  %v1574_v12 = vld [vmem:[%s2160_s21 + $0xa4] ss:$16 sps:$4 sm:$0xff]   ;;  %v1576_v15 = vld [vmem:[%s2160_s21 + $0xa0] ss:$16 sps:$4 sm:$0xff]   ;;  %941 = vmatpush1.bf16.msra.mxu1 %v1582_v14  ;;  %v1585_v17 = vld [vmem:[%s2160_s21 + $0xcc] ss:$16 sps:$4 sm:$0xff]  }
  0x94   : > { %901 = vmatprep.subr.bf16.mxu0 %v1571_v10  ;;  %v1577_v16 = vld [vmem:[%s2160_s21 + $0x84] ss:$16 sps:$4 sm:$0xff]   ;;  %v1588_v18 = vld [vmem:[%s2160_s21 + $0xc8] ss:$16 sps:$4 sm:$0xff]   ;;  %942 = vmatprep.subr.bf16.mxu1 %v1585_v17  ;;  %v1581_v19 = vld [vmem:[%s2160_s21 + $0x80] ss:$16 sps:$4 sm:$0xff]  }
  0x95   : > { %v1583_v20 = vld [vmem:[%s2160_s21 + $0x64] ss:$16 sps:$4 sm:$0xff]   ;;  %v1591_v21 = vld [vmem:[%s2160_s21 + $0xac] ss:$16 sps:$4 sm:$0xff]   ;;  %v1594_v22 = vld [vmem:[%s2160_s21 + $0xa8] ss:$16 sps:$4 sm:$0xff]  }
  0x96   : > { %v1597_v23 = vld [vmem:[%s2160_s21 + $0x8c] ss:$16 sps:$4 sm:$0xff]   ;;  %v1587_v24 = vld [vmem:[%s2160_s21 + $0x60] ss:$16 sps:$4 sm:$0xff]   ;;  %v1589_v25 = vld [vmem:[%s2160_s21 + $0x44] ss:$16 sps:$4 sm:$0xff]  }
  0x97   : > { %902 = vmatpush1.bf16.msra.mxu0 %v1573_v11  ;;  %943 = vmatpush1.bf16.msra.mxu1 %v1588_v18  ;;  %v1600_v26 = vld [vmem:[%s2160_s21 + $0x88] ss:$16 sps:$4 sm:$0xff]   ;;  %v1603_v27 = vld [vmem:[%s2160_s21 + $0x6c] ss:$16 sps:$4 sm:$0xff]   ;;  %v1593_v28 = vld [vmem:[%s2160_s21 + $0x40] ss:$16 sps:$4 sm:$0xff]  }
  0x98   : > { %903 = vmatprep.subr.bf16.mxu0 %v1574_v12  ;;  %944 = vmatprep.subr.bf16.mxu1 %v1591_v21  ;;  %v1595_v29 = vld [vmem:[%s2160_s21 + $0x24] ss:$16 sps:$4 sm:$0xff]   ;;  %v1606_v30 = vld [vmem:[%s2160_s21 + $0x68] ss:$16 sps:$4 sm:$0xff]   ;;  %v1609_v31 = vld [vmem:[%s2160_s21 + $0x4c] ss:$16 sps:$4 sm:$0xff]   ;;  %v559_v12 = vlaneseq }
  0x99   : > { %v1599_v32 = vld [vmem:[%s2160_s21 + $0x20] ss:$16 sps:$4 sm:$0xff]   ;;  %v1601_v33 = vld [vmem:[%s2160_s21 + $0x4] ss:$16 sps:$4 sm:$0xff]   ;;  %v1612_v34 = vld [vmem:[%s2160_s21 + $0x48] ss:$16 sps:$4 sm:$0xff]  }
  0x9a   : > { %v1615_v35 = vld [vmem:[%s2160_s21 + $0x2c] ss:$16 sps:$4 sm:$0xff]   ;;  %v1605_v36 = vld [vmem:[%s2160_s21] ss:$16 sps:$4 sm:$0xff]   ;;  %v1607_v37 = vld [vmem:[%s2160_s21 + $0x1e4] ss:$16 sps:$4 sm:$0xff]  }
  0x9b   : > { %904 = vmatpush1.bf16.msra.mxu0 %v1576_v15  ;;  %945 = vmatpush1.bf16.msra.mxu1 %v1594_v22  ;;  %v1618_v38 = vld [vmem:[%s2160_s21 + $0x28] ss:$16 sps:$4 sm:$0xff]   ;;  %v1621_v39 = vld [vmem:[%s2160_s21 + $0xc] ss:$16 sps:$4 sm:$0xff]   ;;  %v1611_v40 = vld [vmem:[%s2160_s21 + $0x1e0] ss:$16 sps:$4 sm:$0xff]  }
  0x9c   : > { %905 = vmatprep.subr.bf16.mxu0 %v1577_v16  ;;  %946 = vmatprep.subr.bf16.mxu1 %v1597_v23  ;;  %v1613_v41 = vld [vmem:[%s2160_s21 + $0x1c4] ss:$16 sps:$4 sm:$0xff]   ;;  %v1624_v42 = vld [vmem:[%s2160_s21 + $0x8] ss:$16 sps:$4 sm:$0xff]   ;;  %v1627_v43 = vld [vmem:[%s2160_s21 + $0x1ec] ss:$16 sps:$4 sm:$0xff]  }
  0x9d   : > { %v1617_v44 = vld [vmem:[%s2160_s21 + $0x1c0] ss:$16 sps:$4 sm:$0xff]   ;;  %v1619_v45 = vld [vmem:[%s2160_s21 + $0x1a4] ss:$16 sps:$4 sm:$0xff]   ;;  %v1630_v46 = vld [vmem:[%s2160_s21 + $0x1e8] ss:$16 sps:$4 sm:$0xff]  }
  0x9e   : > { %v1633_v47 = vld [vmem:[%s2160_s21 + $0x1cc] ss:$16 sps:$4 sm:$0xff]   ;;  %v1623_v49 = vld [vmem:[%s2160_s21 + $0x1a0] ss:$16 sps:$4 sm:$0xff]   ;;  %v1625_v51 = vld [vmem:[%s2160_s21 + $0x184] ss:$16 sps:$4 sm:$0xff]  }
  0x9f   : > { %906 = vmatpush1.bf16.msra.mxu0 %v1581_v19  ;;  %947 = vmatpush1.bf16.msra.mxu1 %v1600_v26  ;;  %v487_v48 = vld [vmem:[%s2173_s17] sm:$0xff]  ;;  %v1629_v54 = vld [vmem:[%s2160_s21 + $0x180] ss:$16 sps:$4 sm:$0xff]   ;;  %v1631_v55 = vld [vmem:[%s2160_s21 + $0x164] ss:$16 sps:$4 sm:$0xff]   ;;  %v560_v13 = vshrl.u32 %v559_v12, 7 }
  0xa0   : > { %907 = vmatprep.subr.bf16.mxu0 %v1583_v20  ;;  %948 = vmatprep.subr.bf16.mxu1 %v1603_v27  ;;  %v492_v50 = vpack.c.bf16 %v487_v48, %v487_v48  ;;  %v1636_v52 = vld [vmem:[%s2160_s21 + $0x1c8] ss:$16 sps:$4 sm:$0xff]   ;;  %v1639_v53 = vld [vmem:[%s2160_s21 + $0x1ac] ss:$16 sps:$4 sm:$0xff]   ;;  %v1635_v58 = vld [vmem:[%s2160_s21 + $0x160] ss:$16 sps:$4 sm:$0xff]  }
  0xa1   : > { %v1642_v56 = vld [vmem:[%s2160_s21 + $0x1a8] ss:$16 sps:$4 sm:$0xff]   ;;  %v1645_v57 = vld [vmem:[%s2160_s21 + $0x18c] ss:$16 sps:$4 sm:$0xff]   ;;  %v1637_v59 = vld [vmem:[%s2160_s21 + $0x144] ss:$16 sps:$4 sm:$0xff]  }
  0xa2   : > { %931 = vmatprep.mubr.bf16.mxu0 %v492_v50  ;;  %972 = vmatprep.mubr.bf16.mxu1 %v492_v50  ;;  %v1648_v60 = vld [vmem:[%s2160_s21 + $0x188] ss:$16 sps:$4 sm:$0xff]   ;;  %v1651_v61 = vld [vmem:[%s2160_s21 + $0x16c] ss:$16 sps:$4 sm:$0xff]   ;;  %v1641_v62 = vld [vmem:[%s2160_s21 + $0x140] ss:$16 sps:$4 sm:$0xff]  }
  0xa3   : > { %908 = vmatpush1.bf16.msra.mxu0 %v1587_v24  ;;  %949 = vmatpush1.bf16.msra.mxu1 %v1606_v30  ;;  %v1643_v63 = vld [vmem:[%s2160_s21 + $0x124] ss:$16 sps:$4 sm:$0xff]   ;;  %v1654_v0 = vld [vmem:[%s2160_s21 + $0x168] ss:$16 sps:$4 sm:$0xff]   ;;  %v1655_v1 = vld [vmem:[%s2160_s21 + $0x14c] ss:$16 sps:$4 sm:$0xff]  }
  0xa4   : > { %909 = vmatprep.subr.bf16.mxu0 %v1589_v25  ;;  %950 = vmatprep.subr.bf16.mxu1 %v1609_v31  ;;  %v1647_v2 = vld [vmem:[%s2160_s21 + $0x120] ss:$16 sps:$4 sm:$0xff]   ;;  %v1649_v3 = vld [vmem:[%s2160_s21 + $0x104] ss:$16 sps:$4 sm:$0xff]   ;;  %v1657_v4 = vld [vmem:[%s2160_s21 + $0x148] ss:$16 sps:$4 sm:$0xff]  }
  0xa5   : > { %v1658_v5 = vld [vmem:[%s2160_s21 + $0x12c] ss:$16 sps:$4 sm:$0xff]   ;;  %v1653_v6 = vld [vmem:[%s2160_s21 + $0x100] ss:$16 sps:$4 sm:$0xff]   ;;  %v1660_v8 = vld [vmem:[%s2160_s21 + $0x128] ss:$16 sps:$4 sm:$0xff]  }
  0xa6   : > { %v489_v7 = vld [vmem:[#allocation2] sm:$0xff]  ;;  %v561_v14 = vsub.s32 0, %v560_v13  ;;  %v557_v15 = vld [vmem:[%s2180_s27] sm:$0xf]  ;;  %v565_v16 = vsub.s32 1, %v560_v13  ;;  %v573_v25 = vsub.s32 3, %v560_v13 }
  0xa7   : > { %910 = vmatpush1.bf16.msra.mxu0 %v1593_v28  ;;  %951 = vmatpush1.bf16.msra.mxu1 %v1612_v34  ;;  %v1661_v9 = vld [vmem:[%s2160_s21 + $0x10c] ss:$16 sps:$4 sm:$0xff]   ;;  %v491_v10 = vpack.c.bf16 %v489_v7, %v489_v7  ;;  %v1663_v11 = vld [vmem:[%s2160_s21 + $0x108] ss:$16 sps:$4 sm:$0xff]   ;;  %p1438_p10 = scmp.ne.s32.totalorder %s2064_s22, 1 }
  0xa8   : > { %911 = vmatprep.subr.bf16.mxu0 %v1595_v29  ;;  %952 = vmatprep.subr.bf16.mxu1 %v1615_v35  ;;  %v562_v17 = vrot.slane %v557_v15, %v561_v14  ;;  %v566_v18 = vrot.slane %v557_v15, %v565_v16  ;;  %v569_v29 = vsub.s32 2, %v560_v13  ;;  %v574_v31 = vrot.slane %v557_v15, %v573_v25 }
  0xab   : > { %912 = vmatpush1.bf16.msra.mxu0 %v1599_v32  ;;  %953 = vmatpush1.bf16.msra.mxu1 %v1618_v38 }
  0xac   : > { %913 = vmatprep.subr.bf16.mxu0 %v1601_v33  ;;  %954 = vmatprep.subr.bf16.mxu1 %v1621_v39  ;;  %v570_v33 = vrot.slane %v557_v15, %v569_v29 }
  0xaf   : > { %914 = vmatpush1.bf16.msra.mxu0 %v1605_v36  ;;  %955 = vmatpush1.bf16.msra.mxu1 %v1624_v42 }
  0xb0   : > { %915 = vmatprep.subr.bf16.mxu0 %v1607_v37  ;;  %956 = vmatprep.subr.bf16.mxu1 %v1627_v43 }
  0xb3   : > { %916 = vmatpush2.bf16.msra.mxu0 %v1611_v40  ;;  %957 = vmatpush2.bf16.msra.mxu1 %v1630_v46 }
  0xb4   : > { %917 = vmatprep.subr.bf16.mxu0 %v1613_v41  ;;  %958 = vmatprep.subr.bf16.mxu1 %v1633_v47 }
  0xb7   : > { %918 = vmatpush2.bf16.msra.mxu0 %v1617_v44  ;;  %959 = vmatpush2.bf16.msra.mxu1 %v1636_v52 }
  0xb8   : > { %919 = vmatprep.subr.bf16.mxu0 %v1619_v45  ;;  %960 = vmatprep.subr.bf16.mxu1 %v1639_v53  ;;  %v1000_v45 = vld [vmem:[%s2178_s16] sm:$0xff] }
  0xbb   : > { %920 = vmatpush2.bf16.msra.mxu0 %v1623_v49  ;;  %961 = vmatpush2.bf16.msra.mxu1 %v1642_v56 }
  0xbc   : > { %921 = vmatprep.subr.bf16.mxu0 %v1625_v51  ;;  %962 = vmatprep.subr.bf16.mxu1 %v1645_v57 }
  0xbf   : > { %922 = vmatpush2.bf16.msra.mxu0 %v1629_v54  ;;  %963 = vmatpush2.bf16.msra.mxu1 %v1648_v60 }
  0xc0   : > { %923 = vmatprep.subr.bf16.mxu0 %v1631_v55  ;;  %964 = vmatprep.subr.bf16.mxu1 %v1651_v61 }
  0xc3   : > { %924 = vmatpush2.bf16.msra.mxu0 %v1635_v58  ;;  %965 = vmatpush2.bf16.msra.mxu1 %v1654_v0 }
  0xc4   : > { %925 = vmatprep.subr.bf16.mxu0 %v1637_v59  ;;  %966 = vmatprep.subr.bf16.mxu1 %v1655_v1 }
  0xc7   : > { %926 = vmatpush2.bf16.msra.mxu0 %v1641_v62  ;;  %967 = vmatpush2.bf16.msra.mxu1 %v1657_v4 }
  0xc8   : > { %927 = vmatprep.subr.bf16.mxu0 %v1643_v63  ;;  %968 = vmatprep.subr.bf16.mxu1 %v1658_v5 }
  0xcb   : > { %928 = vmatpush2.bf16.msra.mxu0 %v1647_v2  ;;  %969 = vmatpush2.bf16.msra.mxu1 %v1660_v8 }
  0xcc   : > { %929 = vmatprep.subr.bf16.mxu0 %v1649_v3  ;;  %970 = vmatprep.subr.bf16.mxu1 %v1661_v9 }
  0xcf   : > { %930 = vmatpush2.bf16.msra.mxu0 %v1653_v6  ;;  %971 = vmatpush2.bf16.msra.mxu1 %v1663_v11 }
  0xd2   : > { %932 = vmatmul.mubr.bf16.vlgmr.msra.gmra.mxu0 %v491_v10  ;;  %973 = vmatmul.mubr.bf16.vlgmr.msra.gmra.mxu1 %v491_v10 }
 0x192   : > { %v933_v19 = vpop.f32.mrf.mxu0  ;;  %v974_v27 = vpop.f32.mrf.mxu1 }
 0x193   : > { %v934_v20 = vadd.f32 %v933_v19, %v562_v17  ;;  %v975_v36 = vadd.f32 %v974_v27, %v570_v33 }
 0x194   : > { %v935_v21 = vpop.f32.mrf.mxu0  ;;  %v976_v30 = vpop.f32.mrf.mxu1 }
 0x195   : > { %v1435_v22 = vmul.f32 -1.442695, %v934_v20  ;;  %v936_v23 = vadd.f32 %v935_v21, %v566_v18  ;;  %v977_v35 = vadd.f32 %v976_v30, %v574_v31 }
 0x196   : > { %v937_v24 = vpop.f32.mrf.mxu0  ;;  %v978_v32 = vpop.f32.mrf.mxu1 }
 0x197   : > { %1664 = vpow2.f32 %v1435_v22  ;;  %v1436_v26 = vmul.f32 -1.442695, %v936_v23  ;;  %v1437_v37 = vmul.f32 -1.442695, %v977_v35 }
 0x198   : > { %v938_v28 = vpop.f32.mrf.mxu0  ;;  %v979_v34 = vpop.f32.mrf.mxu1 }
 0x199   : > { %1666 = vpow2.f32 %v1436_v26 }
 0x19a   : > { %1668 = vtanh.f32 %v975_v36 }
 0x19b   : > { %1670 = vpow2.f32 %v1437_v37 }
 0x1a4   : > { %v1665_v38 = vpop.eup %1664 }
 0x1a5   : > { %v984_v39 = vadd.f32 1.0, %v1665_v38 }
 0x1a6   : > { %v1667_v40 = vpop.eup %1666 }
 0x1a7   : > { %1672 = vrcp.f32 %v984_v39  ;;  %v990_v41 = vadd.f32 1.0, %v1667_v40  ;;  %v1669_v42 = vpop.eup %1668 }
 0x1a8   : > { %v1671_v43 = vpop.eup %1670 }
 0x1a9   : > { %1674 = vrcp.f32 %v990_v41  ;;  %v997_v47 = vadd.f32 1.0, %v1671_v43 }
 0x1ab   : > { %1676 = vrcp.f32 %v997_v47 }
 0x1b4   : > { %v1673_v44 = vpop.eup %1672 }
 0x1b5   : > { %v1002_v49 = vmul.f32 %v1673_v44, %v1669_v42 }
 0x1b6   : > { %v1675_v46 = vpop.eup %1674 }
 0x1b7   : > { %v1001_v48 = vmul.f32 %v1675_v46, %v1000_v45 }
 0x1b8   : > { %v1677_v51 = vpop.eup %1676 }
 0x1b9   : > { %v1003_v50 = vadd.f32 %v1002_v49, %v1001_v48 }
 0x1bb   : > { %1678 = vtanh.f32 %v1003_v50  ;;  %1007 = vst [vmem:[%s2184_s24] sm:$0xff] %v1003_v50 }
 0x1c7   : > { %1012 = sbr.rel (%p1438_p10) target bundleno = 692 (0x2b4), region = 68 }
 0x1c8   : > { %v1679_v52 = vpop.eup %1678 }
 0x1c9   : > { %v1005_v53 = vmul.f32 %v1679_v52, %v1677_v51 }
 0x1cb   : > { %1006 = vst [vmem:[%s2182_s26] sm:$0xff] %v1005_v53  ;;  %1008 = vst [vmem:[#allocation2] sm:$0xff] %v1005_v53 }
 0x1cc   : > { %v1680_v54 = vld [vmem:[%s2362_s6 + $0x38] sm:$0xff]   ;;  %v1920_v55 = vmov 0.0   ;;  %v1681_v56 = vld [vmem:[%s2362_s6 + $0x30] sm:$0xff]   ;;  %vm1921_vm0 = vmmov 0   ;;  %v1682_v57 = vld [vmem:[%s2362_s6 + $0x28] sm:$0xff]   ;;  %v1013_v63 = vpack.c.bf16 %v1005_v53, %v1005_v53 }
 0x1cd   : > { %1467 = vmatprep.subr.bf16.mxu0 %v1920_v55  ;;  %1483 = vmatprep.mubr.msk.bf16.mxu0 %vm1921_vm0, %v1920_v55  ;;  %v1683_v58 = vld [vmem:[%s2362_s6 + $0x20] sm:$0xff]   ;;  %v1684_v59 = vld [vmem:[%s2362_s6 + $0x18] sm:$0xff]   ;;  %v1685_v60 = vld [vmem:[%s2362_s6 + $0x10] sm:$0xff]  }
 0x1ce   : > { %1468 = vmatpush3.bf16.msra.mxu0 %v1680_v54  ;;  %v1686_v61 = vld [vmem:[%s2362_s6 + $0x8] sm:$0xff]   ;;  %v1687_v62 = vld [vmem:[%s2362_s6] sm:$0xff]  }
 0x1cf   : > { %1469 = vmatprep.subr.bf16.mxu0 %v1920_v55  ;;  %v1439_v0 = vld [vmem:[%s2363_s7] ss:$0 sm:$0xff] }
 0x1d2   : > { %1470 = vmatpush3.bf16.msra.mxu0 %v1681_v56 }
 0x1d3   : > { %1471 = vmatprep.subr.bf16.mxu0 %v1920_v55 }
 0x1d6   : > { %1472 = vmatpush3.bf16.msra.mxu0 %v1682_v57 }
 0x1d7   : > { %1473 = vmatprep.subr.bf16.mxu0 %v1920_v55 }
 0x1da   : > { %1474 = vmatpush3.bf16.msra.mxu0 %v1683_v58 }
 0x1db   : > { %1475 = vmatprep.subr.bf16.mxu0 %v1920_v55 }
 0x1de   : > { %1476 = vmatpush3.bf16.msra.mxu0 %v1684_v59 }
 0x1df   : > { %1477 = vmatprep.subr.bf16.mxu0 %v1920_v55 }
 0x1e2   : > { %1478 = vmatpush3.bf16.msra.mxu0 %v1685_v60 }
 0x1e3   : > { %1479 = vmatprep.subr.bf16.mxu0 %v1920_v55 }
 0x1e6   : > { %1480 = vmatpush3.bf16.msra.mxu0 %v1686_v61 }
 0x1e7   : > { %1481 = vmatprep.subr.bf16.mxu0 %v1920_v55 }
 0x1ea   : > { %1482 = vmatpush3.bf16.msra.mxu0 %v1687_v62 }
 0x1ed   : > { %1484 = vmatmul.mubr.bf16.vlgmr.msra.gmra.mxu0 %v1013_v63 }
 0x2ad   : > { %v1119_v1 = vpop.f32.mrf.mxu0 }
 0x2ae   : > { %v1120_v2 = vadd.f32 %v1439_v0, %v1119_v1 }
 0x2af   : > { %v1485_v3 = vpop.f32.mrf.mxu0 }
 0x2b0   : > { %1125 = vst [vmem:[#allocation14] sm:$0xff] %v1120_v2 }
 0x2b1   : > { %v1122_v4 = vpop.f32.mrf.mxu0 }
 0x2b3   : > { %v1486_v5 = vpop.f32.mrf.mxu0 }
 0x2b4 PF: > { %s1450_s2 = sshll.u32 %s2064_s22, 7  ;;  %s1158_s19 = sshll.u32 %s2184_s24, 4  ;;  %s1159_s19 = int_to_ptr.vmem [resolvable:$true] %s1158_s19 }
 0x2b5   : > { %s1156_s5 = scalar_lea.hbm %s2365_s9, %s1450_s2  ;;  %s2407_s21 = sand.u32 1, %s2064_s22  }
 0x2b6   : > { %s1132_s17 = scalar_lea.sflag [#allocation13], %s2407_s21  ;;  %s1782_s16 = scalar_lea.vmem %s1159_s19, 128 }
 0x2b7   : > { %p1783_p2 = scmp.ne.s32.totalorder %s1159_s19, %s1782_s16  ;;  %p2408_p12 = scmp.ne.s32.totalorder %s2392_s11, 0 }
 0x2b8   : > { %s1922_s27 = smov [#allocation12]  }
 0x2b9   : > { %p1784_p13 = pnand %p1783_p2, %p2408_p12  ;;  %s1786_s14 = sshll.u32 %s1922_s27, 4  ;;  %s1787_s14 = int_to_ptr.vmem [resolvable:$false] %s1786_s14 }
 0x2ba   : > { %s1788_s4 = scalar_lea.vmem %s1787_s14, 256  ;;  %p1789_p8 = scmp.lt.s32.totalorder %s1159_s19, %s1787_s14 }
 0x2bb   : > { %p1785_p5 = pneg %p1784_p13  ;;  %p1790_p4 = scmp.lt.s32.totalorder %s1788_s4, %s1782_s16 }
 0x2bd   : > { %p1791_p7 = por %p1790_p4, %p1789_p8 }
 0x2bf   : > { %p1792_p1 = pnand %p1791_p7, %p1785_p5 }
 0x2c1   : > { %1795 = shalt.err (!%p1792_p1)
}
 0x2c2   : > { %s1796_s28 = scalar_lea.hbm %s1156_s5, 128  ;;  %s1800_s12 = scalar_lea.hbm %s2365_s9, 256 }
 0x2c3   : > { %p1797_p3 = scmp.ne.s32.totalorder %s1156_s5, %s1796_s28  ;;  %p1801_p6 = scmp.lt.s32.totalorder %s1156_s5, %s2365_s9 }
 0x2c4   : > { %p1802_p9 = scmp.lt.s32.totalorder %s1800_s12, %s1796_s28 }
 0x2c5   : > { %p1798_p0 = pnand %p1797_p3, %p2408_p12 }
 0x2c6   : > { %p1803_p10 = por %p1802_p9, %p1801_p6 }
 0x2c7   : > { %p1799_p11 = pneg %p1798_p0 }
 0x2c9   : > { %p1804_p2 = pnand %p1803_p10, %p1799_p11 }
 0x2cb   : > { %1807 = shalt.err (!%p1804_p2)
}
 0x2cc   : > { %1496 = dma.vmem_to_hbm [thread:$0]  (%p2408_p12), %s1159_s19, 128, %s1156_s5, %s1132_s17  }
 0x2cd   : > { %s1143_s29 = scalar_lea.hbm %s2364_s8, %s1450_s2  ;;  %s1145_s1 = sshll.u32 %s2182_s26, 4  ;;  %s1146_s1 = int_to_ptr.vmem [resolvable:$true] %s1145_s1 }
 0x2ce   : > { %s1127_s3 = scalar_lea.sflag [#allocation7], %s2155_s20  ;;  %s1808_s21 = scalar_lea.vmem %s1146_s1, 128 }
 0x2cf   : > { %p1809_p13 = scmp.ne.s32.totalorder %s1146_s1, %s1808_s21  ;;  %s1923_s16 = smov [#allocation11]  }
 0x2d0   : > { %s1812_s27 = sshll.u32 %s1923_s16, 4  ;;  %s1813_s27 = int_to_ptr.vmem [resolvable:$false] %s1812_s27 }
 0x2d1   : > { %p1810_p5 = pnand %p1809_p13, %p2408_p12  ;;  %s1814_s14 = scalar_lea.vmem %s1813_s27, 256 }
 0x2d2   : > { %p1815_p4 = scmp.lt.s32.totalorder %s1146_s1, %s1813_s27  ;;  %p1816_p7 = scmp.lt.s32.totalorder %s1814_s14, %s1808_s21 }
 0x2d3   : > { %p1811_p8 = pneg %p1810_p5 }
 0x2d4   : > { %p1817_p1 = por %p1816_p7, %p1815_p4 }
 0x2d6   : > { %p1818_p3 = pnand %p1817_p1, %p1811_p8 }
 0x2d8   : > { %1821 = shalt.err (!%p1818_p3)
}
 0x2d9   : > { %s1822_s5 = scalar_lea.hbm %s1143_s29, 128  ;;  %s1826_s2 = scalar_lea.hbm %s2364_s8, 256 }
 0x2da   : > { %p1823_p0 = scmp.ne.s32.totalorder %s1143_s29, %s1822_s5  ;;  %p1827_p9 = scmp.lt.s32.totalorder %s1143_s29, %s2364_s8 }
 0x2db   : > { %p1828_p10 = scmp.lt.s32.totalorder %s1826_s2, %s1822_s5 }
 0x2dc   : > { %p1824_p11 = pnand %p1823_p0, %p2408_p12 }
 0x2dd   : > { %p1829_p2 = por %p1828_p10, %p1827_p9 }
 0x2de   : > { %p1825_p6 = pneg %p1824_p11 }
 0x2e0   : > { %p1830_p13 = pnand %p1829_p2, %p1825_p6 }
 0x2e2   : > { %1833 = shalt.err (!%p1830_p13)
}
 0x2e3   : > { %1495 = dma.vmem_to_hbm [thread:$0]  (%p2408_p12), %s1146_s1, 128, %s1143_s29, %s1127_s3  }
 0x2e4   : > { %s1924_s4 = smov [#allocation14]   ;;  %p2409_p8 = scmp.eq.s32.totalorder %s2064_s22, 1 }
 0x2e5   : > { %s1169_s28 = sshll.u32 %s1924_s4, 4  ;;  %s1170_s28 = int_to_ptr.vmem [resolvable:$true] %s1169_s28 }
 0x2e6   : > { %s1834_s24 = scalar_lea.vmem %s1170_s28, 128  ;;  %p1841_p1 = scmp.lt.s32.totalorder %s1170_s28, %s1170_s28 }
 0x2e7   : > { %p1835_p5 = scmp.ne.s32.totalorder %s1170_s28, %s1834_s24  ;;  %p1842_p3 = scmp.lt.s32.totalorder %s1834_s24, %s1834_s24 }
 0x2e9   : > { %p1836_p4 = pnand %p1835_p5, %p2409_p8  ;;  %p1843_p0 = por %p1842_p3, %p1841_p1 }
 0x2eb   : > { %p1837_p7 = pneg %p1836_p4 }
 0x2ed   : > { %p1844_p11 = pnand %p1843_p0, %p1837_p7 }
 0x2ef   : > { %1847 = shalt.err (!%p1844_p11)
}
 0x2f0   : > { %p2410_p6 = pmov %p2409_p8 }
 0x2f2   : > { %1498 = dma.vmem_to_hbm [thread:$0]  (%p2410_p6), %s1170_s28, 128, %s2366_s10, [#allocation13]  }
 0x2f3   : > { %p2411_p12 = pmov %p2410_p6 }
 0x2f4   : > { %p2412_p9 = pmov %p2410_p6 }
 0x2f5   : > { %1885 = dma.done.wait (%p2411_p12), [#allocation13], 128  }
 0x2f6   : > { %1887 = vsyncadd (%p2412_p9), [#allocation13], 4294967168 }
 0x2f7 PF: > { %s2413_s11 = sld [smem:[#allocation25_spill]]  ;;  %s1185_s15 = sand.u32 1, %s1898_s0  }
 0x2f8   : > { %s2414_s23 = sld [smem:[#allocation22_spill]]  ;;  %s1186_s25 = scalar_lea.sflag [#allocation7], %s1185_s15 }
 0x2fd   : > { %p2415_p10 = scmp.ne.s32.totalorder %s2413_s11, 0 }
 0x2fe   : > { %p2416_p2 = scmp.ge.s32.totalorder %s2414_s23, 2 }
 0x300   : > { %p1515_p13 = pnand %p2416_p2, %p2415_p10 }
 0x302   : > { %p1516_p5 = pneg %p1515_p13 }
 0x304   : > { %1889 = dma.done.wait (%p1516_p5), %s1186_s25, 128  }
 0x305   : > { %1891 = vsyncadd (%p1516_p5), %s1186_s25, 4294967168  ;;  %s2417_s13 = sadd.s32 4294967294, %s2414_s23  }
 0x306   : > { %s1194_s29 = sand.u32 1, %s2417_s13  }
 0x307   : > { %s1195_s1 = scalar_lea.sflag [#allocation13], %s1194_s29 }
 0x308   : > { %1893 = dma.done.wait (%p1516_p5), %s1195_s1, 128  }
 0x309   : > { %1895 = vsyncadd (%p1516_p5), %s1195_s1, 4294967168  ;;  %s2418_s20 = sld [smem:[#allocation23_spill]]  ;;  %s2421_s0 = smov %s1902_s18 }
 0x30a   : > { %s2419_s22 = sld [smem:[#allocation21_spill]] }
 0x30b   : > { %s2420_s19 = sld [smem:[#allocation24_spill]] }
 0x30f   : > { %p34_p8 = scmp.ge.s32.totalorder %s2418_s20, 4  }
 0x310   : > { %s2422_s18 = smov %s2419_s22 }
 0x311   :  { %36 = sbr.rel (!%p34_p8) target bundleno = 25 (0x19), region = 156 }
 0x316   :  { %1200 = vsyncpa [#allocation6], 1 }
 0x317   :  { %1202 = vsyncpa [#allocation6 + $0x1], 1 }
 0x318   :  { %1203 = vsyncpa [#allocation9], 1 }
 0x319   :  { %1205 = vsyncpa [#allocation9 + $0x1], 1 }
 0x31a   :  { %1206 = vsyncpa [#allocation7], 1 }
 0x31b   :  { %1208 = vsyncpa [#allocation7 + $0x1], 1 }
 0x31c   :  { %1209 = vsyncpa [#allocation13], 1 }
 0x31d   :  { %1211 = vsyncpa [#allocation13 + $0x1], 1 }

</bundles_post_ra>
